<compile_context>
chip_gen: v6e
topology: v6e:2x2x1
jax: 0.10.0
libtpu: 0.0.40
codegen_flags: <defaults>
</compile_context>

<pallas_src>
import jax
import jax.numpy as jnp
from jax.experimental import pallas as pl
from jax.experimental.pallas import tpu as pltpu


def _round_up(x, m):
    return ((x + m - 1) // m) * m


def _patch_proj_kernel(x_ref, w_ref, b_ref, o_ref):
    # x_ref: (tm, K)      bf16  tile of patch rows
    # w_ref: (K, E_pad)   bf16  full projection weight (VMEM-resident)
    # b_ref: (1, E_pad)   f32   full bias (VMEM-resident)
    # o_ref: (tm, E_pad)  out dtype
    acc = jnp.dot(x_ref[...], w_ref[...], preferred_element_type=jnp.float32)
    o_ref[...] = (acc + b_ref[...]).astype(o_ref.dtype)


def patch_embedding(x, weight, bias, patch_size, *, row_tile=1024,
                    out_dtype=jnp.bfloat16):
    """ViT patch embedding: Conv2d(k=s=P) + flatten(2) + transpose(1, 2).

    x: (B, C, H, W); weight: (E, C, P, P); bias: (E,)  ->  (B, N, E)
    """
    B, C, H, W = x.shape
    E = weight.shape[0]
    P = patch_size
    hp, wp = H // P, W // P
    N = hp * wp
    K = C * P * P
    M = B * N

    # --- patchify glue in the same (c, kh, kw) order as the conv weight -----
    xp = x.reshape(B, C, hp, P, wp, P)
    xp = xp.transpose(0, 2, 4, 1, 3, 5)                 # (B, hp, wp, C, P, P)
    xp = xp.reshape(M, K).astype(jnp.bfloat16)          # (M, K)

    w2d = weight.reshape(E, K).T.astype(jnp.bfloat16)   # (K, E)
    b2d = bias.astype(jnp.float32).reshape(1, E)        # (1, E)

    # --- pad emb dim only if not already lane-dense (multiple of 128) -------
    E_pad = _round_up(E, 128)
    if E_pad != E:
        w2d = jnp.pad(w2d, ((0, 0), (0, E_pad - E)))
        b2d = jnp.pad(b2d, ((0, 0), (0, E_pad - E)))

    # --- 1-D grid over row tiles; no M pad (partial last block is clipped) --
    tm = min(row_tile, _round_up(M, 8))
    grid = (pl.cdiv(M, tm),)

    out_itemsize = jnp.dtype(out_dtype).itemsize
    cost = pl.CostEstimate(
        flops=2 * M * K * E_pad,
        transcendentals=0,
        bytes_accessed=(M * K * 2              # activation tiles (bf16)
                        + K * E_pad * 2        # weight, fetched once
                        + E_pad * 4            # bias, fetched once
                        + M * E_pad * out_itemsize),
    )

    out = pl.pallas_call(
        _patch_proj_kernel,
        out_shape=jax.ShapeDtypeStruct((M, E_pad), out_dtype),
        grid_spec=pltpu.PrefetchScalarGridSpec(
            num_scalar_prefetch=0,
            grid=grid,
            in_specs=[
                pl.BlockSpec((tm, K), lambda i: (i, 0)),      # patch rows
                pl.BlockSpec((K, E_pad), lambda i: (0, 0)),   # full weight
                pl.BlockSpec((1, E_pad), lambda i: (0, 0)),   # full bias
            ],
            out_specs=pl.BlockSpec((tm, E_pad), lambda i: (i, 0)),
        ),
        compiler_params=pltpu.CompilerParams(
            dimension_semantics=("parallel",),
            # Let XLA fold the patchify transpose / bf16 cast into the
            # kernel's activation input instead of a separate HBM round trip.
            allow_input_fusion=[True, False, False],
        ),
        cost_estimate=cost,
    )(xp, w2d, b2d)

    if E_pad != E:
        out = out[:, :E]
    return out.reshape(B, N, E)


if __name__ == "__main__":
    # Small shapes consistent with the module (in_channels=3, patch_size=4;
    # emb_dim / img_size scaled down): B=2, C=3, img=20, patch=4, emb=128.
    B, C, IMG, PATCH, EMB = 2, 3, 20, 4, 128

    key = jax.random.PRNGKey(0)
    kx, kw, kb = jax.random.split(key, 3)
    x = jax.random.normal(kx, (B, C, IMG, IMG), dtype=jnp.float32)
    weight = jax.random.normal(kw, (EMB, C, PATCH, PATCH), dtype=jnp.float32) * 0.02
    bias = jax.random.normal(kb, (EMB,), dtype=jnp.float32) * 0.02

    # row_tile=16 -> M = 2*25 = 50 rows -> 4 grid steps including a partial
    # last block, exercising weight residency across steps and clipped stores.
    out = patch_embedding(x, weight, bias, PATCH, row_tile=16)
    out = jax.block_until_ready(out)

    # Pure-JAX f32 reference (conv with stride == kernel == patch projection).
    hp = wp = IMG // PATCH
    xr = x.reshape(B, C, hp, PATCH, wp, PATCH).transpose(0, 2, 4, 1, 3, 5)
    xr = xr.reshape(B, hp * wp, C * PATCH * PATCH)
    ref = jnp.einsum("bnk,ek->bne", xr, weight.reshape(EMB, -1)) + bias

    assert out.shape == (B, (IMG // PATCH) ** 2, EMB)
    assert out.dtype == jnp.bfloat16
    # bf16 operands/output with f32 accumulate vs pure-f32 reference.
    assert jnp.allclose(out.astype(jnp.float32), ref, atol=2e-2, rtol=2e-2)
    print("KERNEL_OK")
</pallas_src>

<mosaic_0001>
module attributes {stable_mosaic.version = 11 : i64} {
  func.func @_patch_proj_kernel(%arg0: i32, %arg1: memref<16x48xbf16, #tpu.memory_space<vmem>>, %arg2: memref<48x128xbf16, #tpu.memory_space<vmem>>, %arg3: memref<1x128xf32, #tpu.memory_space<vmem>>, %arg4: memref<16x128xbf16, #tpu.memory_space<vmem>>) attributes {dimension_semantics = [#tpu.dimension_semantics<parallel>], iteration_bounds = array<i64: 4>, scalar_prefetch = 0 : i64, scratch_operands = 0 : i64, tpu.core_type = #tpu.core_type<tc>, window_params = [{transform_indices = @transform_0, window_bounds = array<i64: 16, 48>}, {pipeline_mode = #tpu.pipeline_mode<synchronous>, transform_indices = @transform_1, window_bounds = array<i64: 48, 128>}, {pipeline_mode = #tpu.pipeline_mode<synchronous>, transform_indices = @transform_2, window_bounds = array<i64: 1, 128>}, {transform_indices = @transform_3, window_bounds = array<i64: 16, 128>}]} {
    %c0 = arith.constant 0 : index
    %c0_0 = arith.constant 0 : index
    %0 = vector.load %arg1[%c0, %c0_0] : memref<16x48xbf16, #tpu.memory_space<vmem>>, vector<16x48xbf16>
    %c0_1 = arith.constant 0 : index
    %c0_2 = arith.constant 0 : index
    %1 = vector.load %arg2[%c0_1, %c0_2] : memref<48x128xbf16, #tpu.memory_space<vmem>>, vector<48x128xbf16>
    %cst = arith.constant dense<0.000000e+00> : vector<16x128xf32>
    %2 = tpu.matmul %0, %1, %cst {dimension_numbers = #tpu.dot_dimension_numbers<[1], [0], [0], [1], [0, 0, 1, 1], [], []>} : vector<16x48xbf16>, vector<48x128xbf16>, vector<16x128xf32> -> vector<16x128xf32>
    %c0_3 = arith.constant 0 : index
    %c0_4 = arith.constant 0 : index
    %3 = vector.load %arg3[%c0_3, %c0_4] : memref<1x128xf32, #tpu.memory_space<vmem>>, vector<1x128xf32>
    %4 = vector.broadcast %3 : vector<1x128xf32> to vector<16x128xf32>
    %5 = arith.addf %2, %4 : vector<16x128xf32>
    %6 = arith.truncf %5 : vector<16x128xf32> to vector<16x128xbf16>
    %c0_5 = arith.constant 0 : index
    %c0_6 = arith.constant 0 : index
    %7 = vector.load %arg4[%c0_5, %c0_6] : memref<16x128xbf16, #tpu.memory_space<vmem>>, vector<16x128xbf16>
    tpu.vector_store %arg4[%c0_5, %c0_6], %6 {strides = array<i32>} : memref<16x128xbf16, #tpu.memory_space<vmem>>, vector<16x128xbf16>,
    return
  }
  func.func @transform_0(%arg0: i32) -> (i32, i32) {
    %c0_i32 = arith.constant 0 : i32
    %c0_i32_0 = arith.constant 0 : i32
    return %arg0, %c0_i32 : i32, i32
  }
  func.func @transform_1(%arg0: i32) -> (i32, i32) {
    %c0_i32 = arith.constant 0 : i32
    %c0_i32_0 = arith.constant 0 : i32
    %c0_i32_1 = arith.constant 0 : i32
    return %c0_i32, %c0_i32_0 : i32, i32
  }
  func.func @transform_2(%arg0: i32) -> (i32, i32) {
    %c0_i32 = arith.constant 0 : i32
    %c0_i32_0 = arith.constant 0 : i32
    %c0_i32_1 = arith.constant 0 : i32
    return %c0_i32, %c0_i32_0 : i32, i32
  }
  func.func @transform_3(%arg0: i32) -> (i32, i32) {
    %c0_i32 = arith.constant 0 : i32
    %c0_i32_0 = arith.constant 0 : i32
    return %arg0, %c0_i32 : i32, i32
  }
}

</mosaic_0001>

<bundles_post_ra>
// kernel: tpu_custom_call.1
= control target key start
LH: loop header
LB: loop body
LE: loop exit
PB: predicated region body
PF: predicated region fallthrough
CT: control target
= control target key end

     0   :  { %8 = vsyncpa [#allocation3], 0  ;;  %s679_s0 = inlined_call_operand.vmem [shape: bf16[50,48], index: 0, kind: input, shape index: {}]   ;;  %s680_s1 = inlined_call_operand.vmem [shape: bf16[48,128], index: 1, kind: input, shape index: {}]   ;;  %s681_s2 = inlined_call_operand.vmem [shape: f32[1,128], index: 2, kind: input, shape index: {}]   ;;  %s682_s3 = inlined_call_operand.hbm [shape: bf16[50,128], index: 3, kind: output, shape index: {}]  }
   0x1   :  { %10 = vsyncpa [#allocation3 + $0x1], 0  ;;  %s551_s12 = smov 0   ;;  %s553_s13 = smov 0  }
   0x2   :  { %s555_s14 = smov 0   ;;  %s557_s15 = smov 0  }
   0x3 LB: > { %s572_s16 = sadd.s32 4294967295, %s524_s15   ;;  %s372_s17 = sadd.s32 4294967294, %s524_s15   ;;  %s524_s15 = sphi %s557_s15, %s688_s15   ;;  %s520_s14 = sphi %s555_s14, %s687_s14   ;;  %s516_s13 = sphi %s553_s13, %s686_s13   ;;  %s512_s12 = sphi %s551_s12, %s685_s12  }
   0x4   : > { %s576_s18 = sadd.s32 1, %s524_s15   ;;  %s91_s19 = sadd.s32 1, %s520_s14 }
   0x5   : > { %s88_s20 = ssub.s32 %s524_s15, %s576_s18  ;;  %p101_p0 = scmp.ne.s32.totalorder %s520_s14, %s516_s13 }
   0x6   : > { %p89_p1 = scmp.eq.s32.totalorder %s88_s20, 0  ;;  %p102_p2 = scmp.eq.s32.totalorder %s572_s16, 3 }
   0x7   : > { %p107_p3 = scmp.ne.s32.totalorder %s516_s13, %s512_s12  ;;  %p108_p4 = scmp.eq.s32.totalorder %s372_s17, 3 }
   0x8   : > { %s587_s21 = scalar_select %p89_p1, %s520_s14, %s91_s19  }
   0x9   : > { %p589_p5 = por %p102_p2, %p101_p0  ;;  %p593_p6 = por %p108_p4, %p107_p3 }
   0xa   : > { %p375_p7 = scmp.ge.s32.totalorder %s524_s15, 1  ;;  %p149_p8 = scmp.lt.s32.totalorder %s524_s15, 5 }
   0xc   : > { %p150_p9 = pnand %p375_p7, %p149_p8 }
   0xd   : > { %s606_s28 = sshll.u32 (!%p150_p9), %s572_s16, 1  ;;  %s174_s9 = sand.u32 (!%p150_p9), 1, %s516_s13  }
   0xe   : > { %153 = sbr.rel (%p150_p9) target bundleno = 261 (0x105), region = 32  ;;  %p182_p10 = scmp.lt.s32.totalorder (!%p150_p9), %s606_s28, 6 }
   0xf   : > { %s376_s17 = sshll.u32 (!%p150_p9), %s174_s9, 3  ;;  %s620_s20 = scalar_lea.sflag (!%p150_p9), [#allocation3], %s174_s9 }
  0x10   : > { %s176_s19 = scalar_lea.vmem (!%p150_p9), [#allocation2], %s376_s17 }
  0x13   : > { %v460_v0 = vld [vmem:[%s680_s1 + $0x10] sm:$0xff]   ;;  %v526_v1 = vmov 0.0   ;;  %v461_v2 = vld [vmem:[%s680_s1 + $0x8] sm:$0xff]   ;;  %vm527_vm0 = vmmov 0   ;;  %s183_s29 = scalar_select %p182_p10, %s606_s28, 6  ;;  %v462_v3 = vld [vmem:[%s680_s1] sm:$0xff]  }
  0x14   : > { %408 = vmatprep.subr.bf16.mxu0 %v526_v1  ;;  %414 = vmatprep.mubr.msk.bf16.mxu0 %vm527_vm0, %v526_v1  ;;  %vm235_vm1 = vcmask 392192   ;;  %v379_v6 = vld [vmem:[%s681_s2] ss:$0 sm:$0xff]  ;;  %s299_s24 = ssub.s32 (%p589_p5), 7, %s606_s28 }
  0x15   : > { %409 = vmatpush3.bf16.msra.mxu0 %v460_v0  ;;  %s378_s5 = sshll.u32 %s183_s29, 2  ;;  %p300_p11 = scmp.lt.s32.totalorder (%p589_p5), %s299_s24, 2 }
  0x16   : > { %410 = vmatprep.subr.bf16.mxu0 %v526_v1  ;;  %s185_s8 = scalar_lea.vmem %s679_s0, %s378_s5 }
  0x17   : > { %v463_v4 = vld [vmem:[%s185_s8] sm:$0xff]  }
  0x19   : > { %411 = vmatpush3.bf16.msra.mxu0 %v461_v2 }
  0x1a   : > { %412 = vmatprep.subr.bf16.mxu0 %v526_v1 }
  0x1d   : > { %413 = vmatpush3.bf16.msra.mxu0 %v462_v3 }
  0x20   : > { %415 = vmatmul.mubr.msk.bf16.vlgmr.msra.gmra.mxu0 %vm235_vm1, %v463_v4 }
  0xe0   : > { %v273_v5 = vpop.f32.mrf.mxu0 }
  0xe1   : > { %v274_v9 = vadd.f32 %v379_v6, %v273_v5 }
  0xe2   : > { %v416_v7 = vpop.f32.mrf.mxu0 }
  0xe4   : > { %v276_v8 = vpop.f32.mrf.mxu0 }
  0xe5   : > { %v277_v10 = vadd.f32 %v379_v6, %v276_v8  ;;  %297 = sbr.rel (!%p589_p5) target bundleno = 261 (0x105), region = 36 }
  0xe6   : > { %v417_v11 = vpop.f32.mrf.mxu0 }
  0xe7   : > { %v402_v12 = vpack.c.bf16 %v277_v10, %v274_v9 }
  0xe9   : > { %403 = vst [vmem:[%s176_s19] sm:$0xff] %v402_v12  }
  0xea   : > { %s690_s24 = smov (!%p300_p11, %s299_s24), 2 }
  0xeb   : > { %s625_s25 = sshll.u32 %s690_s24, 6 }
  0xec   : > { %s304_s26 = ssub.s32 128, %s625_s25 }
  0xed   : > { %305 = vsyncadd %s620_s20, %s304_s26  ;;  %p390_p12 = scmp.ne.s32.totalorder %s625_s25, 0  ;;  %s398_s27 = sshll.u32 %s572_s16, 7 }
  0xee   : > { %s634_s22 = scalar_lea.hbm %s682_s3, %s398_s27  ;;  %s310_s4 = sshll.u32 %s176_s19, 4  ;;  %s636_s4 = int_to_ptr.vmem [resolvable:$true] %s310_s4 }
  0xef   : > { %s464_s28 = scalar_lea.vmem %s636_s4, %s625_s25  ;;  %s528_s5 = smov [#allocation2]  }
  0xf0   : > { %p465_p13 = scmp.ne.s32.totalorder %s636_s4, %s464_s28  ;;  %s468_s6 = sshll.u32 %s528_s5, 4  ;;  %s469_s6 = int_to_ptr.vmem [resolvable:$false] %s468_s6 }
  0xf1   : > { %s470_s16 = scalar_lea.vmem %s469_s6, 256  ;;  %p471_p2 = scmp.lt.s32.totalorder %s636_s4, %s469_s6 }
  0xf2   : > { %p466_p0 = pnand %p465_p13, %p390_p12  ;;  %p472_p3 = scmp.lt.s32.totalorder %s470_s16, %s464_s28 }
  0xf4   : > { %p467_p1 = pneg %p466_p0  ;;  %p473_p4 = por %p472_p3, %p471_p2 }
  0xf6   : > { %p474_p5 = pnand %p473_p4, %p467_p1 }
  0xf8   : > { %477 = shalt.err (!%p474_p5)
}
  0xf9   : > { %s478_s7 = scalar_lea.hbm %s634_s22, %s625_s25  ;;  %s482_s10 = scalar_lea.hbm %s682_s3, 448 }
  0xfa   : > { %p479_p7 = scmp.ne.s32.totalorder %s634_s22, %s478_s7  ;;  %p483_p10 = scmp.lt.s32.totalorder %s634_s22, %s682_s3 }
  0xfb   : > { %p484_p11 = scmp.lt.s32.totalorder %s482_s10, %s478_s7 }
  0xfc   : > { %p480_p8 = pnand %p479_p7, %p390_p12 }
  0xfd   : > { %p485_p13 = por %p484_p11, %p483_p10 }
  0xfe   : > { %p481_p9 = pneg %p480_p8 }
 0x100   : > { %p486_p0 = pnand %p485_p13, %p481_p9 }
 0x102   : > { %489 = shalt.err (!%p486_p0)
}
 0x103   : > { %s529_s19 = smov 64   ;;  %s530_s24 = smov 4  }
 0x104   : > { %316 = dma.vmem_to_hbm [thread:$0]  (%p390_p12), %s636_s4, %s625_s25, %s634_s22, %s620_s20, %s529_s19, %s529_s19, %s530_s24  }
 0x105 PF: > { %p423_p1 = scmp.ge.s32.totalorder %s524_s15, 2  ;;  %s325_s26 = sand.u32 1, %s512_s12  }
 0x106   : > { %s326_s27 = scalar_lea.sflag [#allocation3], %s325_s26 }
 0x107   : > { %p420_p2 = pnand %p423_p1, %p593_p6 }
 0x109   : > { %p421_p3 = pneg %p420_p2 }
 0x10b   : > { %507 = dma.done.wait (%p421_p3), %s326_s27, 128  }
 0x10c   : > { %509 = vsyncadd (%p421_p3), %s326_s27, 4294967168  ;;  %p13_p4 = scmp.ge.s32.totalorder %s576_s18, 6   ;;  %s685_s12 = smov %s516_s13 }
 0x10d   : > { %s686_s13 = smov %s520_s14  ;;  %s687_s14 = smov %s587_s21 }
 0x10e   : > { %s688_s15 = smov %s576_s18  ;;  %15 = sbr.rel (!%p13_p4) target bundleno = 3 (0x3), region = 67 }
 0x113   :  { %331 = vsyncpa [#allocation3], 1 }
 0x114   :  { %333 = vsyncpa [#allocation3 + $0x1], 1 }

</bundles_post_ra>
